<compile_context>
chip_gen: v7x
topology: tpu7x:2x2x1
jax: 0.10.0
libtpu: 0.0.40
codegen_flags: <defaults>
</compile_context>

<pallas_src>
import functools

import jax
import jax.numpy as jnp
from jax.experimental import pallas as pl
from jax.experimental.pallas import tpu as pltpu


def _attention_kernel(src_ref, srct_ref, tgt_ref, weight_ref, attn_ref):
    # src_ref    : (BB, idf, L)   hoisted conv1x1(context)
    # srct_ref   : (BB, L, idf)   same, pre-transposed in the wrapper
    # tgt_ref    : (BB, idf, HW)  flattened input feature maps
    # weight_ref : (BB, idf, HW)  output weighted context features
    # attn_ref   : (BB, L, HW)    output attention maps (already transposed)
    BB = src_ref.shape[0]
    for b in range(BB):  # small static unroll (BB <= 8)
        src = src_ref[b]                       # (idf, L)
        src_t = srct_ref[b]                    # (L, idf)
        tgt = tgt_ref[b]                       # (idf, HW)

        # scores^T = src^T @ tgt  (contract idf) -> (L, HW), lane-dense.
        scores_t = jnp.dot(src_t, tgt, preferred_element_type=jnp.float32)

        # TODO(synk): optional self.mask (masked_fill with -inf before the
        # softmax) is not implemented; mask is None in the reference forward.

        # Softmax over the context dimension L (axis 0 = sublane reduce).
        m = jnp.max(scores_t, axis=0, keepdims=True)       # (1, HW)
        e = jnp.exp(scores_t - m)                           # (L, HW)
        denom = jnp.sum(e, axis=0, keepdims=True)           # (1, HW)
        probs = e / denom                                    # exact softmax

        # weight = src @ probs  (contract L) -> (idf, HW)
        out_w = jnp.dot(src, probs.astype(src.dtype),
                        preferred_element_type=jnp.float32)

        weight_ref[b] = out_w.astype(weight_ref.dtype)
        attn_ref[b] = probs.astype(attn_ref.dtype)


@functools.partial(jax.jit, static_argnames=("bf16_matmul", "batch_block"))
def attention_module(inp, context, conv_w, *, bf16_matmul=False,
                     batch_block=8):
    """inp: (B, idf, H, W), context: (B, cdf, L), conv_w: (idf, cdf)."""
    B, idf, H, W = inp.shape
    _, cdf, L = context.shape
    HW = H * W

    tgt = inp.reshape(B, idf, HW)                           # (B, idf, HW)
    # Hoisted 1x1 conv: one matmul over all batches instead of B tiny ones.
    src = jnp.einsum('oc,bcl->bol', conv_w, context)        # (B, idf, L)
    src_t = jnp.swapaxes(src, 1, 2)                         # (B, L, idf)

    if bf16_matmul:  # MXU takes bf16 natively on v5e/v6e/v7x; acc stays f32.
        tgt = tgt.astype(jnp.bfloat16)
        src = src.astype(jnp.bfloat16)
        src_t = src_t.astype(jnp.bfloat16)

    # Capped batch block: small fixed unroll, grid grows with B.
    BB = max(1, min(batch_block, B))
    B_pad = ((B + BB - 1) // BB) * BB
    if B_pad != B:
        pad = ((0, B_pad - B), (0, 0), (0, 0))
        tgt = jnp.pad(tgt, pad)
        src = jnp.pad(src, pad)
        src_t = jnp.pad(src_t, pad)
    grid_b = B_pad // BB

    weight, attn = pl.pallas_call(
        _attention_kernel,
        out_shape=(
            jax.ShapeDtypeStruct((B_pad, idf, HW), inp.dtype),
            jax.ShapeDtypeStruct((B_pad, L, HW), inp.dtype),
        ),
        grid=(grid_b,),
        in_specs=[
            pl.BlockSpec((BB, idf, L), lambda g: (g, 0, 0)),    # src
            pl.BlockSpec((BB, L, idf), lambda g: (g, 0, 0)),    # src^T
            pl.BlockSpec((BB, idf, HW), lambda g: (g, 0, 0)),   # target
        ],
        out_specs=(
            pl.BlockSpec((BB, idf, HW), lambda g: (g, 0, 0)),   # weight
            pl.BlockSpec((BB, L, HW), lambda g: (g, 0, 0)),     # attn (L, HW)
        ),
        compiler_params=pltpu.CompilerParams(
            dimension_semantics=("parallel",)),
    )(src, src_t, tgt)

    weight = weight[:B].reshape(B, idf, H, W)
    attn = attn[:B].reshape(B, L, H, W)
    return weight, attn


def _reference(inp, context, conv_w):
    B, idf, H, W = inp.shape
    tgt = inp.reshape(B, idf, H * W)                         # (B, idf, HW)
    src = jnp.einsum('oc,bcl->bol', conv_w, context)         # (B, idf, L)
    scores = jnp.einsum('bip,bil->bpl', tgt, src)            # (B, HW, L)
    probs = jax.nn.softmax(scores, axis=-1)                  # softmax over L
    attn_t = jnp.swapaxes(probs, 1, 2)                       # (B, L, HW)
    weight = jnp.einsum('bil,blp->bip', src, attn_t)         # (B, idf, HW)
    return weight.reshape(B, idf, H, W), attn_t.reshape(B, -1, H, W)


def _check(B, idf, cdf, H, W, L, seed, atol=1e-5, rtol=1e-5):
    key = jax.random.PRNGKey(seed)
    k1, k2, k3 = jax.random.split(key, 3)
    inp = jax.random.normal(k1, (B, idf, H, W), dtype=jnp.float32)
    context = jax.random.normal(k2, (B, cdf, L), dtype=jnp.float32)
    conv_w = jax.random.normal(k3, (idf, cdf), dtype=jnp.float32) * 0.1

    weight, attn = attention_module(inp, context, conv_w)
    jax.block_until_ready((weight, attn))

    ref_w, ref_a = _reference(inp, context, conv_w)
    assert jnp.allclose(weight, ref_w, atol=atol, rtol=rtol), "weight mismatch"
    assert jnp.allclose(attn, ref_a, atol=atol, rtol=rtol), "attn mismatch"


if __name__ == "__main__":
    # Small shapes consistent with the module: idf=32, cdf=16, H=W=16, L=8.
    _check(B=2, idf=32, cdf=16, H=16, W=16, L=8, seed=0)
    # Exercise the padded / multi-grid-step path (B=10 -> BB=8, grid=2).
    _check(B=10, idf=32, cdf=16, H=16, W=16, L=8, seed=0)
    print("KERNEL_OK")
</pallas_src>

<mosaic_0001>
module attributes {stable_mosaic.version = 11 : i64} {
  func.func @_attention_kernel(%arg0: i32, %arg1: memref<2x32x8xf32, #tpu.memory_space<vmem>>, %arg2: memref<2x8x32xf32, #tpu.memory_space<vmem>>, %arg3: memref<2x32x256xf32, #tpu.memory_space<vmem>>, %arg4: memref<2x32x256xf32, #tpu.memory_space<vmem>>, %arg5: memref<2x8x256xf32, #tpu.memory_space<vmem>>) attributes {dimension_semantics = [#tpu.dimension_semantics<parallel>], iteration_bounds = array<i64: 1>, scalar_prefetch = 0 : i64, scratch_operands = 0 : i64, tpu.core_type = #tpu.core_type<tc>, window_params = [{transform_indices = @transform_0, window_bounds = array<i64: 2, 32, 8>}, {transform_indices = @transform_1, window_bounds = array<i64: 2, 8, 32>}, {transform_indices = @transform_2, window_bounds = array<i64: 2, 32, 256>}, {transform_indices = @transform_3, window_bounds = array<i64: 2, 32, 256>}, {transform_indices = @transform_4, window_bounds = array<i64: 2, 8, 256>}]} {
    %c0 = arith.constant 0 : index
    %c0_0 = arith.constant 0 : index
    %c0_1 = arith.constant 0 : index
    %0 = vector.load %arg1[%c0, %c0_0, %c0_1] : memref<2x32x8xf32, #tpu.memory_space<vmem>>, vector<1x32x8xf32>
    %1 = vector.shape_cast %0 : vector<1x32x8xf32> to vector<32x8xf32>
    %c0_2 = arith.constant 0 : index
    %c0_3 = arith.constant 0 : index
    %c0_4 = arith.constant 0 : index
    %2 = vector.load %arg2[%c0_2, %c0_3, %c0_4] : memref<2x8x32xf32, #tpu.memory_space<vmem>>, vector<1x8x32xf32>
    %3 = vector.shape_cast %2 : vector<1x8x32xf32> to vector<8x32xf32>
    %c0_5 = arith.constant 0 : index
    %c0_6 = arith.constant 0 : index
    %c0_7 = arith.constant 0 : index
    %4 = vector.load %arg3[%c0_5, %c0_6, %c0_7] : memref<2x32x256xf32, #tpu.memory_space<vmem>>, vector<1x32x256xf32>
    %5 = vector.shape_cast %4 : vector<1x32x256xf32> to vector<32x256xf32>
    %cst = arith.constant dense<0.000000e+00> : vector<8x256xf32>
    %6 = tpu.matmul %3, %5, %cst {dimension_numbers = #tpu.dot_dimension_numbers<[1], [0], [0], [1], [0, 0, 1, 1], [], []>} : vector<8x32xf32>, vector<32x256xf32>, vector<8x256xf32> -> vector<8x256xf32>
    %cst_8 = arith.constant dense<0xFF800000> : vector<256xf32>
    %7 = vector.multi_reduction <maximumf>, %6, %cst_8 [0] : vector<8x256xf32> to vector<256xf32>
    %8 = vector.shape_cast %7 : vector<256xf32> to vector<1x256xf32>
    %9 = vector.broadcast %8 : vector<1x256xf32> to vector<8x256xf32>
    %10 = arith.subf %6, %9 : vector<8x256xf32>
    %11 = math.exp %10 : vector<8x256xf32>
    %cst_9 = arith.constant dense<0.000000e+00> : vector<256xf32>
    %12 = vector.multi_reduction <add>, %11, %cst_9 [0] : vector<8x256xf32> to vector<256xf32>
    %13 = vector.shape_cast %12 : vector<256xf32> to vector<1x256xf32>
    %14 = vector.broadcast %13 : vector<1x256xf32> to vector<8x256xf32>
    %15 = arith.divf %11, %14 : vector<8x256xf32>
    %cst_10 = arith.constant dense<0.000000e+00> : vector<32x256xf32>
    %16 = tpu.matmul %1, %15, %cst_10 {dimension_numbers = #tpu.dot_dimension_numbers<[1], [0], [0], [1], [0, 0, 1, 1], [], []>} : vector<32x8xf32>, vector<8x256xf32>, vector<32x256xf32> -> vector<32x256xf32>
    %c0_11 = arith.constant 0 : index
    %c0_12 = arith.constant 0 : index
    %c0_13 = arith.constant 0 : index
    %17 = vector.load %arg4[%c0_11, %c0_12, %c0_13] : memref<2x32x256xf32, #tpu.memory_space<vmem>>, vector<1x32x256xf32>
    %18 = vector.shape_cast %17 : vector<1x32x256xf32> to vector<32x256xf32>
    %19 = vector.shape_cast %16 : vector<32x256xf32> to vector<1x32x256xf32>
    tpu.vector_store %arg4[%c0_11, %c0_12, %c0_13], %19 {strides = array<i32>} : memref<2x32x256xf32, #tpu.memory_space<vmem>>, vector<1x32x256xf32>,
    %c0_14 = arith.constant 0 : index
    %c0_15 = arith.constant 0 : index
    %c0_16 = arith.constant 0 : index
    %20 = vector.load %arg5[%c0_14, %c0_15, %c0_16] : memref<2x8x256xf32, #tpu.memory_space<vmem>>, vector<1x8x256xf32>
    %21 = vector.shape_cast %20 : vector<1x8x256xf32> to vector<8x256xf32>
    %22 = vector.shape_cast %15 : vector<8x256xf32> to vector<1x8x256xf32>
    tpu.vector_store %arg5[%c0_14, %c0_15, %c0_16], %22 {strides = array<i32>} : memref<2x8x256xf32, #tpu.memory_space<vmem>>, vector<1x8x256xf32>,
    %c1 = arith.constant 1 : index
    %c0_17 = arith.constant 0 : index
    %c0_18 = arith.constant 0 : index
    %23 = vector.load %arg1[%c1, %c0_17, %c0_18] : memref<2x32x8xf32, #tpu.memory_space<vmem>>, vector<1x32x8xf32>
    %24 = vector.shape_cast %23 : vector<1x32x8xf32> to vector<32x8xf32>
    %c1_19 = arith.constant 1 : index
    %c0_20 = arith.constant 0 : index
    %c0_21 = arith.constant 0 : index
    %25 = vector.load %arg2[%c1_19, %c0_20, %c0_21] : memref<2x8x32xf32, #tpu.memory_space<vmem>>, vector<1x8x32xf32>
    %26 = vector.shape_cast %25 : vector<1x8x32xf32> to vector<8x32xf32>
    %c1_22 = arith.constant 1 : index
    %c0_23 = arith.constant 0 : index
    %c0_24 = arith.constant 0 : index
    %27 = vector.load %arg3[%c1_22, %c0_23, %c0_24] : memref<2x32x256xf32, #tpu.memory_space<vmem>>, vector<1x32x256xf32>
    %28 = vector.shape_cast %27 : vector<1x32x256xf32> to vector<32x256xf32>
    %cst_25 = arith.constant dense<0.000000e+00> : vector<8x256xf32>
    %29 = tpu.matmul %26, %28, %cst_25 {dimension_numbers = #tpu.dot_dimension_numbers<[1], [0], [0], [1], [0, 0, 1, 1], [], []>} : vector<8x32xf32>, vector<32x256xf32>, vector<8x256xf32> -> vector<8x256xf32>
    %cst_26 = arith.constant dense<0xFF800000> : vector<256xf32>
    %30 = vector.multi_reduction <maximumf>, %29, %cst_26 [0] : vector<8x256xf32> to vector<256xf32>
    %31 = vector.shape_cast %30 : vector<256xf32> to vector<1x256xf32>
    %32 = vector.broadcast %31 : vector<1x256xf32> to vector<8x256xf32>
    %33 = arith.subf %29, %32 : vector<8x256xf32>
    %34 = math.exp %33 : vector<8x256xf32>
    %cst_27 = arith.constant dense<0.000000e+00> : vector<256xf32>
    %35 = vector.multi_reduction <add>, %34, %cst_27 [0] : vector<8x256xf32> to vector<256xf32>
    %36 = vector.shape_cast %35 : vector<256xf32> to vector<1x256xf32>
    %37 = vector.broadcast %36 : vector<1x256xf32> to vector<8x256xf32>
    %38 = arith.divf %34, %37 : vector<8x256xf32>
    %cst_28 = arith.constant dense<0.000000e+00> : vector<32x256xf32>
    %39 = tpu.matmul %24, %38, %cst_28 {dimension_numbers = #tpu.dot_dimension_numbers<[1], [0], [0], [1], [0, 0, 1, 1], [], []>} : vector<32x8xf32>, vector<8x256xf32>, vector<32x256xf32> -> vector<32x256xf32>
    %c1_29 = arith.constant 1 : index
    %c0_30 = arith.constant 0 : index
    %c0_31 = arith.constant 0 : index
    %40 = vector.load %arg4[%c1_29, %c0_30, %c0_31] : memref<2x32x256xf32, #tpu.memory_space<vmem>>, vector<1x32x256xf32>
    %41 = vector.shape_cast %40 : vector<1x32x256xf32> to vector<32x256xf32>
    %42 = vector.shape_cast %39 : vector<32x256xf32> to vector<1x32x256xf32>
    tpu.vector_store %arg4[%c1_29, %c0_30, %c0_31], %42 {strides = array<i32>} : memref<2x32x256xf32, #tpu.memory_space<vmem>>, vector<1x32x256xf32>,
    %c1_32 = arith.constant 1 : index
    %c0_33 = arith.constant 0 : index
    %c0_34 = arith.constant 0 : index
    %43 = vector.load %arg5[%c1_32, %c0_33, %c0_34] : memref<2x8x256xf32, #tpu.memory_space<vmem>>, vector<1x8x256xf32>
    %44 = vector.shape_cast %43 : vector<1x8x256xf32> to vector<8x256xf32>
    %45 = vector.shape_cast %38 : vector<8x256xf32> to vector<1x8x256xf32>
    tpu.vector_store %arg5[%c1_32, %c0_33, %c0_34], %45 {strides = array<i32>} : memref<2x8x256xf32, #tpu.memory_space<vmem>>, vector<1x8x256xf32>,
    return
  }
  func.func @transform_0(%arg0: i32) -> (i32, i32, i32) {
    %c0_i32 = arith.constant 0 : i32
    %c0_i32_0 = arith.constant 0 : i32
    %c0_i32_1 = arith.constant 0 : i32
    return %arg0, %c0_i32, %c0_i32_0 : i32, i32, i32
  }
  func.func @transform_1(%arg0: i32) -> (i32, i32, i32) {
    %c0_i32 = arith.constant 0 : i32
    %c0_i32_0 = arith.constant 0 : i32
    %c0_i32_1 = arith.constant 0 : i32
    return %arg0, %c0_i32, %c0_i32_0 : i32, i32, i32
  }
  func.func @transform_2(%arg0: i32) -> (i32, i32, i32) {
    %c0_i32 = arith.constant 0 : i32
    %c0_i32_0 = arith.constant 0 : i32
    %c0_i32_1 = arith.constant 0 : i32
    return %arg0, %c0_i32, %c0_i32_0 : i32, i32, i32
  }
  func.func @transform_3(%arg0: i32) -> (i32, i32, i32) {
    %c0_i32 = arith.constant 0 : i32
    %c0_i32_0 = arith.constant 0 : i32
    %c0_i32_1 = arith.constant 0 : i32
    return %arg0, %c0_i32, %c0_i32_0 : i32, i32, i32
  }
  func.func @transform_4(%arg0: i32) -> (i32, i32, i32) {
    %c0_i32 = arith.constant 0 : i32
    %c0_i32_0 = arith.constant 0 : i32
    %c0_i32_1 = arith.constant 0 : i32
    return %arg0, %c0_i32, %c0_i32_0 : i32, i32, i32
  }
}

</mosaic_0001>

<bundles_post_ra>
// kernel: attention_module.1
= control target key start
LH: loop header
LB: loop body
LE: loop exit
PB: predicated region body
PF: predicated region fallthrough
CT: control target
= control target key end

     0   :  { %v563_v3 = vmov 0.0   ;;  %vm29_vm0 = vcmask 261120   ;;  %vm138_vm1 = vcmask 64512   ;;  %s747_s2 = inlined_call_operand.vmem [shape: f32[2,32,256], index: 2, kind: input, shape index: {}]   ;;  %s748_s1 = inlined_call_operand.vmem [shape: f32[2,8,32], index: 1, kind: input, shape index: {}]   ;;  %s749_s4 = inlined_call_operand.vmem [shape: f32[2,8,256], index: 4, kind: output, shape index: {1}]   ;;  %s750_s0 = inlined_call_operand.vmem [shape: f32[2,32,8], index: 0, kind: input, shape index: {}]   ;;  %s751_s3 = inlined_call_operand.vmem [shape: f32[2,32,256], index: 3, kind: output, shape index: {0}]  }
   0x1   :  { %v22_v0 = vld [vmem:[%s747_s2 + $0x8] sm:$0xff]  ;;  %v24_v1 = vld [vmem:[%s747_s2 + $0x18] sm:$0xff]  ;;  %v21_v2 = vld [vmem:[%s747_s2] sm:$0xff]  ;;  %97 = vmatprep.mubr.f32.mxu0 %v563_v3  ;;  %227 = vmatprep.mubr.f32.mxu1 %v563_v3 }
   0x2   :  { %v528_v4 = vpack.c.bf16 %v24_v1, %v22_v0  ;;  %v23_v5 = vld [vmem:[%s747_s2 + $0x10] sm:$0xff]  ;;  %v26_v6 = vld [vmem:[%s747_s2 + $0x28] sm:$0xff]  ;;  %v28_v7 = vld [vmem:[%s747_s2 + $0x38] sm:$0xff] }
   0x3   :  { %v530_v8 = vpack.c.bf16 %v23_v5, %v21_v2  ;;  %v532_v9 = vpack.c.bf16 %v28_v7, %v26_v6  ;;  %v25_v10 = vld [vmem:[%s747_s2 + $0x20] sm:$0xff]  ;;  %v27_v11 = vld [vmem:[%s747_s2 + $0x30] sm:$0xff]  ;;  %v506_v46 = vld [vmem:[%s747_s2 + $0x48] sm:$0xff] }
   0x4   :  { %529 = vmatprep.subr.bf16.mxu0 %v528_v4  ;;  %v534_v12 = vpack.c.bf16 %v27_v11, %v25_v10  ;;  %v20_v13 = vld [vmem:[%s748_s1] sm:$0xff]  ;;  %v508_v47 = vld [vmem:[%s747_s2 + $0x58] sm:$0xff]  ;;  %v507_v50 = vld [vmem:[%s747_s2 + $0x50] sm:$0xff] }
   0x5   :  { %531 = vmatpush1.bf16.msra.mxu0 %v530_v8  ;;  %v505_v49 = vld [vmem:[%s747_s2 + $0x40] sm:$0xff]  ;;  %v510_v53 = vld [vmem:[%s747_s2 + $0x68] sm:$0xff]  ;;  %v512_v54 = vld [vmem:[%s747_s2 + $0x78] sm:$0xff]  ;;  %v536_v56 = vpack.c.bf16 %v508_v47, %v506_v46 }
   0x6   :  { %533 = vmatprep.subr.bf16.mxu0 %v532_v9  ;;  %v16_v57 = vld [vmem:[%s750_s0] sm:$0xff]  ;;  %v538_v58 = vpack.c.bf16 %v507_v50, %v505_v49  ;;  %v540_v59 = vpack.c.bf16 %v512_v54, %v510_v53  ;;  %v511_v61 = vld [vmem:[%s747_s2 + $0x70] sm:$0xff]  ;;  %v17_v62 = vld [vmem:[%s750_s0 + $0x8] sm:$0xff] }
   0x7   :  { %v509_v60 = vld [vmem:[%s747_s2 + $0x60] sm:$0xff]  ;;  %v504_v0 = vld [vmem:[%s748_s1 + $0x8] sm:$0xff]  ;;  %v18_v1 = vld [vmem:[%s750_s0 + $0x10] sm:$0xff] }
   0x8   :  { %v542_v63 = vpack.c.bf16 %v511_v61, %v509_v60  ;;  %v19_v2 = vld [vmem:[%s750_s0 + $0x18] sm:$0xff]  ;;  %v502_v46 = vld [vmem:[%s750_s0 + $0x30] sm:$0xff] }
   0x9   :  { %535 = vmatpush1.bf16.msra.mxu0 %v534_v12  ;;  %v503_v47 = vld [vmem:[%s750_s0 + $0x38] sm:$0xff] }
   0xc   :  { %495 = vmatmul.mubr.msk.f32.vlgmr.msra.gmra.mrb[0].mxu0 %vm29_vm0, %v20_v13 }
   0xd   :  { %215 = vmatprep.mubr.f32.mxu0 %v563_v3 }
  0xdf   :  { %v99_v14 = vpop.f32.mrb[0].mxu0 }
  0xe0   :  { %v104_v15 = vrot.slane %v99_v14, 4  ;;  %v101_v16 = vpop.f32.mrb[1].mxu0 }
  0xe1   :  { %v110_v17 = vrot.slane %v101_v16, 4 }
  0xe2   :  { %v105_v18 = vmax.f32 %v99_v14, %v104_v15 }
  0xe3   :  { %v111_v19 = vmax.f32 %v101_v16, %v110_v17 }
  0xe4   :  { %v106_v20 = vrot.slane %v105_v18, 2 }
  0xe5   :  { %v112_v21 = vrot.slane %v111_v19, 2 }
  0xe6   :  { %v107_v22 = vmax.f32 %v105_v18, %v106_v20 }
  0xe7   :  { %v113_v23 = vmax.f32 %v111_v19, %v112_v21 }
  0xe8   :  { %v108_v24 = vrot.slane %v107_v22, 1 }
  0xe9   :  { %v114_v25 = vrot.slane %v113_v23, 1 }
  0xea   :  { %v109_v26 = vmax.f32 %v107_v22, %v108_v24 }
  0xeb   :  { %v115_v27 = vmax.f32 %v113_v23, %v114_v25 }
  0xec   :  { %v116_v28 = vsub.f32 %v99_v14, %v109_v26 }
  0xed   :  { %v117_v29 = vsub.f32 %v101_v16, %v115_v27 }
  0xee   :  { %v118_v30 = vmul.f32 1.442695, %v116_v28 }
  0xef   :  { %v120_v31 = vmul.f32 1.442695, %v117_v29 }
  0xf0   :  { %547 = vpow2.f32 %v118_v30 }
  0xf1   :  { %549 = vpow2.f32 %v120_v31 }
  0xfa   :  { %v548_v32 = vpop.eup %547 }
  0xfb   :  { %v550_v33 = vpop.eup %549  ;;  %v122_v34 = vrot.slane %v548_v32, 4 }
  0xfc   :  { %v128_v35 = vrot.slane %v550_v33, 4 }
  0xfd   :  { %v123_v36 = vadd.f32 %v548_v32, %v122_v34 }
  0xfe   :  { %v129_v37 = vadd.f32 %v550_v33, %v128_v35 }
  0xff   :  { %v124_v38 = vrot.slane %v123_v36, 2 }
 0x100   :  { %v130_v39 = vrot.slane %v129_v37, 2 }
 0x101   :  { %v125_v40 = vadd.f32 %v124_v38, %v123_v36 }
 0x102   :  { %v131_v41 = vadd.f32 %v130_v39, %v129_v37 }
 0x103   :  { %v126_v42 = vrot.slane %v125_v40, 1 }
 0x104   :  { %v132_v43 = vrot.slane %v131_v41, 1 }
 0x105   :  { %v127_v44 = vadd.f32 %v126_v42, %v125_v40 }
 0x106   :  { %v133_v45 = vadd.f32 %v132_v43, %v131_v41 }
 0x107   :  { %551 = vrcp.f32 %v127_v44  ;;  %v500_v44 = vld [vmem:[%s750_s0 + $0x20] sm:$0xff] }
 0x108   :  { %553 = vrcp.f32 %v133_v45  ;;  %v501_v45 = vld [vmem:[%s750_s0 + $0x28] sm:$0xff] }
 0x111   :  { %v552_v48 = vpop.eup %551 }
 0x112   :  { %v554_v51 = vpop.eup %553  ;;  %v135_v52 = vmul.f32 %v552_v48, %v548_v32 }
 0x113   :  { %v137_v55 = vmul.f32 %v554_v51, %v550_v33 }
 0x114   :  { %248 = vst [vmem:[%s749_s4] sm:$0xff] %v135_v52 }
 0x115   :  { %151 = vmatprep.subr.mxu0 %v137_v55  ;;  %249 = vst [vmem:[%s749_s4 + $0x8] sm:$0xff] %v137_v55  ;;  %544 = vmatprep.subr.mxu1 %v137_v55 }
 0x116   :  { %152 = vmatpush1.msra.mxu0 %v135_v52  ;;  %545 = vmatpush1.msra.mxu1 %v135_v52 }
 0x117   :  { %496 = vmatmul.mubr.msk.f32.vlgmr.msra.gmra.mrb[2].mxu0 %vm138_vm1, %v16_v57  ;;  %537 = vmatprep.subr.bf16.mxu0 %v536_v56 }
 0x118   :  { %539 = vmatpush1.bf16.msra.mxu0 %v538_v58  ;;  %221 = vmatprep.mubr.f32.mxu0 %v563_v3 }
 0x119   :  { %541 = vmatprep.subr.bf16.mxu0 %v540_v59  ;;  %498 = vmatmul.mubr.msk.f32.vlgmr.msra.gmra.mrb[0].mxu1 %vm138_vm1, %v18_v1 }
 0x11a   :  { %233 = vmatprep.mubr.f32.mxu1 %v563_v3 }
 0x11b   :  { %497 = vmatmul.mubr.msk.f32.gmra.mrb[4].mxu0 %vm138_vm1, %v17_v62 }
 0x11c   :  { %543 = vmatpush1.bf16.msra.mxu0 %v542_v63  ;;  %333 = vmatprep.mubr.f32.mxu0 %v563_v3 }
 0x11d   :  { %499 = vmatmul.mubr.msk.f32.gmra.mrb[2].mxu1 %vm138_vm1, %v19_v2 }
 0x11e   :  { %450 = vmatprep.mubr.f32.mxu1 %v563_v3 }
 0x11f   :  { %513 = vmatmul.mubr.msk.f32.vlgmr.msra.gmra.mrb[6].mxu0 %vm29_vm0, %v504_v0 }
 0x1ea   :  { %v217_v4 = vpop.f32.mrb[2].mxu0 }
 0x1eb   :  { %240 = vst [vmem:[%s751_s3] sm:$0xff] %v217_v4  ;;  %v219_v5 = vpop.f32.mrb[3].mxu0 }
 0x1ec   :  { %241 = vst [vmem:[%s751_s3 + $0x8] sm:$0xff] %v219_v5  ;;  %v229_v48 = vpop.f32.mrb[0].mxu1 }
 0x1ed   :  { %244 = vst [vmem:[%s751_s3 + $0x20] sm:$0xff] %v229_v48  ;;  %v231_v49 = vpop.f32.mrb[1].mxu1 }
 0x1ee   :  { %v223_v6 = vpop.f32.mrb[4].mxu0  ;;  %245 = vst [vmem:[%s751_s3 + $0x28] sm:$0xff] %v231_v49 }
 0x1ef   :  { %242 = vst [vmem:[%s751_s3 + $0x10] sm:$0xff] %v223_v6  ;;  %v225_v7 = vpop.f32.mrb[5].mxu0 }
 0x1f0   :  { %243 = vst [vmem:[%s751_s3 + $0x18] sm:$0xff] %v225_v7  ;;  %v235_v50 = vpop.f32.mrb[2].mxu1 }
 0x1f1   :  { %246 = vst [vmem:[%s751_s3 + $0x30] sm:$0xff] %v235_v50 }
 0x1f2   :  { %v335_v8 = vpop.f32.mrb[6].mxu0 }
 0x1f3   :  { %v340_v9 = vrot.slane %v335_v8, 4  ;;  %v337_v10 = vpop.f32.mrb[7].mxu0 }
 0x1f4   :  { %v346_v11 = vrot.slane %v337_v10, 4 }
 0x1f5   :  { %v341_v12 = vmax.f32 %v335_v8, %v340_v9 }
 0x1f6   :  { %v347_v13 = vmax.f32 %v337_v10, %v346_v11 }
 0x1f7   :  { %v342_v14 = vrot.slane %v341_v12, 2 }
 0x1f8   :  { %v348_v15 = vrot.slane %v347_v13, 2 }
 0x1f9   :  { %v343_v16 = vmax.f32 %v341_v12, %v342_v14 }
 0x1fa   :  { %v349_v17 = vmax.f32 %v347_v13, %v348_v15 }
 0x1fb   :  { %v344_v18 = vrot.slane %v343_v16, 1 }
 0x1fc   :  { %v350_v19 = vrot.slane %v349_v17, 1 }
 0x1fd   :  { %v345_v20 = vmax.f32 %v343_v16, %v344_v18 }
 0x1fe   :  { %v351_v21 = vmax.f32 %v349_v17, %v350_v19 }
 0x1ff   :  { %v352_v22 = vsub.f32 %v335_v8, %v345_v20 }
 0x200   :  { %v353_v23 = vsub.f32 %v337_v10, %v351_v21 }
 0x201   :  { %v354_v24 = vmul.f32 1.442695, %v352_v22 }
 0x202   :  { %v356_v25 = vmul.f32 1.442695, %v353_v23 }
 0x203   :  { %555 = vpow2.f32 %v354_v24 }
 0x204   :  { %557 = vpow2.f32 %v356_v25 }
 0x20d   :  { %v556_v26 = vpop.eup %555 }
 0x20e   :  { %v558_v27 = vpop.eup %557  ;;  %v358_v28 = vrot.slane %v556_v26, 4 }
 0x20f   :  { %v364_v29 = vrot.slane %v558_v27, 4 }
 0x210   :  { %v359_v30 = vadd.f32 %v556_v26, %v358_v28 }
 0x211   :  { %v365_v31 = vadd.f32 %v558_v27, %v364_v29 }
 0x212   :  { %v360_v32 = vrot.slane %v359_v30, 2 }
 0x213   :  { %v366_v33 = vrot.slane %v365_v31, 2 }
 0x214   :  { %v361_v34 = vadd.f32 %v360_v32, %v359_v30 }
 0x215   :  { %v367_v35 = vadd.f32 %v366_v33, %v365_v31 }
 0x216   :  { %v362_v36 = vrot.slane %v361_v34, 1 }
 0x217   :  { %v368_v37 = vrot.slane %v367_v35, 1 }
 0x218   :  { %v363_v38 = vadd.f32 %v362_v36, %v361_v34 }
 0x219   :  { %v369_v39 = vadd.f32 %v368_v37, %v367_v35 }
 0x21a   :  { %559 = vrcp.f32 %v363_v38 }
 0x21b   :  { %561 = vrcp.f32 %v369_v39 }
 0x224   :  { %v560_v40 = vpop.eup %559 }
 0x225   :  { %v562_v41 = vpop.eup %561  ;;  %v371_v42 = vmul.f32 %v560_v40, %v556_v26 }
 0x226   :  { %v373_v43 = vmul.f32 %v562_v41, %v558_v27 }
 0x227   :  { %526 = vst [vmem:[%s749_s4 + $0x10] sm:$0xff] %v371_v42 }
 0x228   :  { %386 = vmatprep.subr.mxu1 %v373_v43  ;;  %527 = vst [vmem:[%s749_s4 + $0x18] sm:$0xff] %v373_v43 }
 0x229   :  { %387 = vmatpush1.msra.mxu1 %v371_v42 }
 0x22a   :  { %514 = vmatmul.mubr.msk.f32.vlgmr.msra.gmra.mrb[4].mxu1 %vm138_vm1, %v500_v44 }
 0x22b   :  { %456 = vmatprep.mubr.f32.mxu1 %v563_v3 }
 0x22e   :  { %515 = vmatmul.mubr.msk.f32.gmra.mrb[6].mxu1 %vm138_vm1, %v501_v45 }
 0x22f   :  { %462 = vmatprep.mubr.f32.mxu1 %v563_v3 }
 0x232   :  { %516 = vmatmul.mubr.msk.f32.gmra.mrb[8].mxu1 %vm138_vm1, %v502_v46 }
 0x233   :  { %468 = vmatprep.mubr.f32.mxu1 %v563_v3  ;;  %v237_v3 = vpop.f32.mrb[3].mxu1 }
 0x234   :  { %247 = vst [vmem:[%s751_s3 + $0x38] sm:$0xff] %v237_v3 }
 0x236   :  { %517 = vmatmul.mubr.msk.f32.gmra.mrb[10].mxu1 %vm138_vm1, %v503_v47 }
 0x2fd   :  { %v452_v51 = vpop.f32.mrb[4].mxu1 }
 0x2fe   :  { %518 = vst [vmem:[%s751_s3 + $0x40] sm:$0xff] %v452_v51  ;;  %v454_v52 = vpop.f32.mrb[5].mxu1 }
 0x2ff   :  { %519 = vst [vmem:[%s751_s3 + $0x48] sm:$0xff] %v454_v52 }
 0x301   :  { %v458_v53 = vpop.f32.mrb[6].mxu1 }
 0x302   :  { %520 = vst [vmem:[%s751_s3 + $0x50] sm:$0xff] %v458_v53  ;;  %v460_v54 = vpop.f32.mrb[7].mxu1 }
 0x303   :  { %521 = vst [vmem:[%s751_s3 + $0x58] sm:$0xff] %v460_v54 }
 0x305   :  { %v464_v55 = vpop.f32.mrb[8].mxu1 }
 0x306   :  { %522 = vst [vmem:[%s751_s3 + $0x60] sm:$0xff] %v464_v55  ;;  %v466_v56 = vpop.f32.mrb[9].mxu1 }
 0x307   :  { %523 = vst [vmem:[%s751_s3 + $0x68] sm:$0xff] %v466_v56 }
 0x309   :  { %v470_v57 = vpop.f32.mrb[10].mxu1 }
 0x30a   :  { %524 = vst [vmem:[%s751_s3 + $0x70] sm:$0xff] %v470_v57  ;;  %v472_v58 = vpop.f32.mrb[11].mxu1 }
 0x30b   :  { %525 = vst [vmem:[%s751_s3 + $0x78] sm:$0xff] %v472_v58 }

</bundles_post_ra>
